<compile_context>
chip_gen: v6e
topology: v6e:2x2x1
jax: 0.10.0
libtpu: 0.0.40
codegen_flags: <defaults>
</compile_context>

<pallas_src>
import jax
import jax.numpy as jnp
import numpy as np
from jax.experimental import pallas as pl
from jax.experimental.pallas import tpu as pltpu


def _round_up(x, m):
    return ((x + m - 1) // m) * m


def _cconv_relu_kernel(p_ref, w_ref, b_ref, o_ref, acc_ref):
    """Fused complex-conv block matmul + bias + split ReLU, K-tiled."""
    k = pl.program_id(1)

    @pl.when(k == 0)
    def _init():
        acc_ref[...] = jnp.zeros_like(acc_ref)

    acc_ref[...] += jnp.dot(p_ref[...], w_ref[...],
                            preferred_element_type=jnp.float32)

    @pl.when(k == pl.num_programs(1) - 1)
    def _finalize():
        out = acc_ref[...] + b_ref[...]
        # complex_relu: ReLU applied independently to real & imaginary halves,
        # which sit side-by-side in the fused output slab.
        o_ref[...] = jnp.maximum(out, 0.0).astype(o_ref.dtype)


def _im2col_s2p1k3(x):
    """x: (N, H, W, C) -> (N, Ho, Wo, 9*C) for kernel 3, stride 2, padding 1."""
    N, H, W, C = x.shape
    Ho = (H + 2 - 3) // 2 + 1
    Wo = (W + 2 - 3) // 2 + 1
    xp = jnp.pad(x, ((0, 0), (1, 1), (1, 1), (0, 0)))
    cols = []
    for kh in range(3):
        for kw in range(3):
            cols.append(xp[:, kh:kh + 2 * Ho:2, kw:kw + 2 * Wo:2, :])
    return jnp.concatenate(cols, axis=-1), Ho, Wo


def cdown_forward(x_real, x_imag, w_r, w_i, b_r, b_i, *,
                  tile_m=512, max_single_k=1024, tile_k=512, use_bf16=False):
    """CDown.forward: complex_relu(ComplexConv2d(x)) with k=3, s=2, p=1.

    x_real, x_imag : (N, Cin, H, W)     complex input, split
    w_r, w_i       : (Cout, Cin, 3, 3)  real/imag conv weights
    b_r, b_i       : (Cout,)            real/imag conv biases
    returns (out_real, out_imag), each (N, Cout, Ho, Wo)
    """
    N, Cin, H, W = x_real.shape
    Cout = w_r.shape[0]

    # NHWC with real/imag concatenated along channels, so a SINGLE im2col
    # yields the fused patch matrix P (per tap: [Cin real, Cin imag]).
    x_cat = jnp.concatenate(
        [jnp.transpose(x_real, (0, 2, 3, 1)),
         jnp.transpose(x_imag, (0, 2, 3, 1))], axis=-1)
    # TODO(synk): form patches inside the kernel via halo DMA for large inputs.
    p, Ho, Wo = _im2col_s2p1k3(x_cat)            # (N, Ho, Wo, 9*2*Cin)

    K2 = 9 * 2 * Cin
    Cout2 = 2 * Cout
    M = N * Ho * Wo
    p = p.reshape(M, K2)

    # Block weight matrix: per tap, rows [Cin real ; Cin imag],
    # columns [real out | imag out]  ->  [[wr, wi], [-wi, wr]].
    wr = jnp.transpose(w_r, (2, 3, 1, 0))        # (3,3,Cin,Cout)
    wi = jnp.transpose(w_i, (2, 3, 1, 0))
    w_blk = jnp.concatenate(
        [jnp.concatenate([wr, wi], axis=-1),     # rows hit by real patches
         jnp.concatenate([-wi, wr], axis=-1)],   # rows hit by imag patches
        axis=2).reshape(K2, Cout2)

    # conv_r carries b_r, conv_i carries b_i:
    #   real = conv_r(x_r) - conv_i(x_i) -> bias (b_r - b_i)
    #   imag = conv_r(x_i) + conv_i(x_r) -> bias (b_r + b_i)
    b_blk = jnp.concatenate([b_r - b_i, b_r + b_i]).reshape(1, Cout2)
    b_blk = b_blk.astype(jnp.float32)

    # ---- tiling / padding ----------------------------------------------------
    tile_m = max(8, min(tile_m, _round_up(M, 8)))
    M_pad = _round_up(M, tile_m)

    if K2 <= max_single_k:
        tk = K2                                   # single K step, full-depth block
    else:
        tk = tile_k                               # multiple of 128 -> valid block
    K_pad = _round_up(K2, tk)

    if use_bf16:
        p = p.astype(jnp.bfloat16)
        w_blk = w_blk.astype(jnp.bfloat16)

    if M_pad != M:
        p = jnp.pad(p, ((0, M_pad - M), (0, 0)))
    if K_pad != K2:
        p = jnp.pad(p, ((0, 0), (0, K_pad - K2)))
        w_blk = jnp.pad(w_blk, ((0, K_pad - K2), (0, 0)))

    grid = (M_pad // tile_m, K_pad // tk)

    itemsize = 2 if use_bf16 else 4
    vmem_est = (2 * tile_m * tk * itemsize        # double-buffered P tile
                + 2 * tk * Cout2 * itemsize       # double-buffered W tile
                + 2 * tile_m * Cout2 * 4          # double-buffered output tile
                + tile_m * Cout2 * 4              # f32 accumulator
                + 2 * Cout2 * 4)                  # bias
    vmem_limit = int(min(max(2 * vmem_est, 32 * 1024 * 1024), 48 * 1024 * 1024))

    out = pl.pallas_call(
        _cconv_relu_kernel,
        out_shape=jax.ShapeDtypeStruct((M_pad, Cout2), jnp.float32),
        grid_spec=pltpu.PrefetchScalarGridSpec(
            num_scalar_prefetch=0,
            grid=grid,
            in_specs=[
                pl.BlockSpec((tile_m, tk), lambda i, k: (i, k)),   # fused patches
                pl.BlockSpec((tk, Cout2), lambda i, k: (k, 0)),    # block weights
                pl.BlockSpec((1, Cout2), lambda i, k: (0, 0)),     # fused bias
            ],
            out_specs=pl.BlockSpec((tile_m, Cout2), lambda i, k: (i, 0)),
            scratch_shapes=[pltpu.VMEM((tile_m, Cout2), jnp.float32)],
        ),
        compiler_params=pltpu.CompilerParams(
            dimension_semantics=("parallel", "arbitrary"),
            vmem_limit_bytes=vmem_limit),
    )(p, w_blk, b_blk)

    out = out[:M]
    out_r = out[:, :Cout].reshape(N, Ho, Wo, Cout)
    out_i = out[:, Cout:].reshape(N, Ho, Wo, Cout)
    # TODO(synk): skip these transposes if downstream consumes NHWC.
    out_r = jnp.transpose(out_r, (0, 3, 1, 2))
    out_i = jnp.transpose(out_i, (0, 3, 1, 2))
    return out_r, out_i


def _conv_ref(x, w, b):
    # reference real conv: x NCHW, w OIHW, stride 2, pad 1
    y = jax.lax.conv_general_dilated(
        x, w, window_strides=(2, 2), padding=((1, 1), (1, 1)),
        dimension_numbers=("NCHW", "OIHW", "NCHW"))
    return y + b.reshape(1, -1, 1, 1)


if __name__ == "__main__":
    key = jax.random.PRNGKey(0)
    k = jax.random.split(key, 6)

    N, Cin, H, W = 2, 4, 16, 16
    Cout = 8

    x_real = jax.random.normal(k[0], (N, Cin, H, W), dtype=jnp.float32)
    x_imag = jax.random.normal(k[1], (N, Cin, H, W), dtype=jnp.float32)

    fan_in = Cin * 3 * 3
    scale = 1.0 / np.sqrt(fan_in)
    w_r = scale * jax.random.normal(k[2], (Cout, Cin, 3, 3), dtype=jnp.float32)
    w_i = scale * jax.random.normal(k[3], (Cout, Cin, 3, 3), dtype=jnp.float32)
    b_r = scale * jax.random.normal(k[4], (Cout,), dtype=jnp.float32)
    b_i = scale * jax.random.normal(k[5], (Cout,), dtype=jnp.float32)

    out_r, out_i = cdown_forward(x_real, x_imag, w_r, w_i, b_r, b_i)
    out_r, out_i = jax.block_until_ready((out_r, out_i))

    # pure-JAX reference (same semantics as the PyTorch module)
    ref_r = jnp.maximum(_conv_ref(x_real, w_r, b_r) - _conv_ref(x_imag, w_i, b_i), 0.0)
    ref_i = jnp.maximum(_conv_ref(x_imag, w_r, b_r) + _conv_ref(x_real, w_i, b_i), 0.0)

    np.testing.assert_allclose(np.asarray(out_r), np.asarray(ref_r), atol=1e-4, rtol=1e-4)
    np.testing.assert_allclose(np.asarray(out_i), np.asarray(ref_i), atol=1e-4, rtol=1e-4)

    print("KERNEL_OK")
</pallas_src>

<mosaic_0001>
module attributes {stable_mosaic.version = 11 : i64} {
  func.func @_cconv_relu_kernel(%arg0: i32, %arg1: i32, %arg2: memref<128x72xf32, #tpu.memory_space<vmem>>, %arg3: memref<72x16xf32, #tpu.memory_space<vmem>>, %arg4: memref<1x16xf32, #tpu.memory_space<vmem>>, %arg5: memref<128x16xf32, #tpu.memory_space<vmem>>, %arg6: memref<128x16xf32, #tpu.memory_space<vmem>>) attributes {dimension_semantics = [#tpu.dimension_semantics<parallel>, #tpu.dimension_semantics<arbitrary>], iteration_bounds = array<i64: 1, 1>, scalar_prefetch = 0 : i64, scratch_operands = 1 : i64, tpu.core_type = #tpu.core_type<tc>, window_params = [{transform_indices = @transform_0, window_bounds = array<i64: 128, 72>}, {transform_indices = @transform_1, window_bounds = array<i64: 72, 16>}, {pipeline_mode = #tpu.pipeline_mode<synchronous>, transform_indices = @transform_2, window_bounds = array<i64: 1, 16>}, {transform_indices = @transform_3, window_bounds = array<i64: 128, 16>}]} {
    %c0_i32 = arith.constant 0 : i32
    %0 = arith.cmpi eq, %arg1, %c0_i32 : i32
    %1 = arith.extui %0 : i1 to i32
    %c0_i32_0 = arith.constant 0 : i32
    %2 = arith.cmpi ne, %1, %c0_i32_0 : i32
    scf.if %2 {
      %cst_10 = arith.constant 0.000000e+00 : f32
      %12 = vector.broadcast %cst_10 : f32 to vector<128x16xf32>
      %c0_11 = arith.constant 0 : index
      %c0_12 = arith.constant 0 : index
      %13 = vector.load %arg6[%c0_11, %c0_12] : memref<128x16xf32, #tpu.memory_space<vmem>>, vector<128x16xf32>
      tpu.vector_store %arg6[%c0_11, %c0_12], %12 {strides = array<i32>} : memref<128x16xf32, #tpu.memory_space<vmem>>, vector<128x16xf32>,
    } else {
    }
    %c0 = arith.constant 0 : index
    %c0_1 = arith.constant 0 : index
    %3 = vector.load %arg6[%c0, %c0_1] : memref<128x16xf32, #tpu.memory_space<vmem>>, vector<128x16xf32>
    %c0_2 = arith.constant 0 : index
    %c0_3 = arith.constant 0 : index
    %4 = vector.load %arg2[%c0_2, %c0_3] : memref<128x72xf32, #tpu.memory_space<vmem>>, vector<128x72xf32>
    %c0_4 = arith.constant 0 : index
    %c0_5 = arith.constant 0 : index
    %5 = vector.load %arg3[%c0_4, %c0_5] : memref<72x16xf32, #tpu.memory_space<vmem>>, vector<72x16xf32>
    %cst = arith.constant dense<0.000000e+00> : vector<128x16xf32>
    %6 = tpu.matmul %4, %5, %cst {dimension_numbers = #tpu.dot_dimension_numbers<[1], [0], [0], [1], [0, 0, 1, 1], [], []>} : vector<128x72xf32>, vector<72x16xf32>, vector<128x16xf32> -> vector<128x16xf32>
    %7 = arith.addf %3, %6 : vector<128x16xf32>
    %c0_6 = arith.constant 0 : index
    %c0_7 = arith.constant 0 : index
    %8 = vector.load %arg6[%c0_6, %c0_7] : memref<128x16xf32, #tpu.memory_space<vmem>>, vector<128x16xf32>
    tpu.vector_store %arg6[%c0_6, %c0_7], %7 {strides = array<i32>} : memref<128x16xf32, #tpu.memory_space<vmem>>, vector<128x16xf32>,
    %c0_i32_8 = arith.constant 0 : i32
    %9 = arith.cmpi eq, %arg1, %c0_i32_8 : i32
    %10 = arith.extui %9 : i1 to i32
    %c0_i32_9 = arith.constant 0 : i32
    %11 = arith.cmpi ne, %10, %c0_i32_9 : i32
    scf.if %11 {
      %c0_10 = arith.constant 0 : index
      %c0_11 = arith.constant 0 : index
      %12 = vector.load %arg6[%c0_10, %c0_11] : memref<128x16xf32, #tpu.memory_space<vmem>>, vector<128x16xf32>
      %c0_12 = arith.constant 0 : index
      %c0_13 = arith.constant 0 : index
      %13 = vector.load %arg4[%c0_12, %c0_13] : memref<1x16xf32, #tpu.memory_space<vmem>>, vector<1x16xf32>
      %14 = vector.broadcast %13 : vector<1x16xf32> to vector<128x16xf32>
      %15 = arith.addf %12, %14 : vector<128x16xf32>
      %cst_14 = arith.constant 0.000000e+00 : f32
      %16 = vector.broadcast %cst_14 : f32 to vector<128x16xf32>
      %17 = arith.maximumf %15, %16 : vector<128x16xf32>
      %c0_15 = arith.constant 0 : index
      %c0_16 = arith.constant 0 : index
      %18 = vector.load %arg5[%c0_15, %c0_16] : memref<128x16xf32, #tpu.memory_space<vmem>>, vector<128x16xf32>
      tpu.vector_store %arg5[%c0_15, %c0_16], %17 {strides = array<i32>} : memref<128x16xf32, #tpu.memory_space<vmem>>, vector<128x16xf32>,
    } else {
    }
    return
  }
  func.func @transform_0(%arg0: i32, %arg1: i32) -> (i32, i32) {
    %c0_i32 = arith.constant 0 : i32
    return %arg0, %arg1 : i32, i32
  }
  func.func @transform_1(%arg0: i32, %arg1: i32) -> (i32, i32) {
    %c0_i32 = arith.constant 0 : i32
    %c0_i32_0 = arith.constant 0 : i32
    return %arg1, %c0_i32 : i32, i32
  }
  func.func @transform_2(%arg0: i32, %arg1: i32) -> (i32, i32) {
    %c0_i32 = arith.constant 0 : i32
    %c0_i32_0 = arith.constant 0 : i32
    %c0_i32_1 = arith.constant 0 : i32
    return %c0_i32, %c0_i32_0 : i32, i32
  }
  func.func @transform_3(%arg0: i32, %arg1: i32) -> (i32, i32) {
    %c0_i32 = arith.constant 0 : i32
    %c0_i32_0 = arith.constant 0 : i32
    return %arg0, %c0_i32 : i32, i32
  }
}

</mosaic_0001>

<bundles_post_ra>
// kernel: tpu_custom_call.1
= control target key start
LH: loop header
LB: loop body
LE: loop exit
PB: predicated region body
PF: predicated region fallthrough
CT: control target
= control target key end

     0   :  { %vm18_vm0 = vcmask 130048   ;;  %v484_v2 = vmov 0.0   ;;  %vm76_vm1 = vcmask 588800   ;;  %s713_s1 = inlined_call_operand.vmem [shape: f32[72,16], index: 1, kind: input, shape index: {}]   ;;  %s714_s0 = inlined_call_operand.vmem [shape: f32[128,72], index: 0, kind: input, shape index: {}]   ;;  %s715_s2 = inlined_call_operand.vmem [shape: f32[1,16], index: 2, kind: input, shape index: {}]   ;;  %s716_s3 = inlined_call_operand.vmem [shape: f32[128,16], index: 3, kind: output, shape index: {}]  }
   0x1   :  { %v75_v0 = vld [vmem:[%s713_s1 + $0x40] sm:$0xff]  ;;  %v74_v1 = vld [vmem:[%s713_s1 + $0x38] sm:$0xff]  ;;  %20 = vst.msk [vmem:[#allocation2 + $0x8] sm:$0xff] %vm18_vm0, %v484_v2  ;;  %19 = vst.msk [vmem:[#allocation2] sm:$0xff] %vm18_vm0, %v484_v2 }
   0x2   :  { %21 = vst.msk [vmem:[#allocation2 + $0x10] sm:$0xff] %vm18_vm0, %v484_v2  ;;  %22 = vst.msk [vmem:[#allocation2 + $0x18] sm:$0xff] %vm18_vm0, %v484_v2  ;;  %423 = vmatprep.subr.mxu0 %v75_v0  ;;  %465 = vmatprep.subr.mxu1 %v75_v0  ;;  %v73_v3 = vld [vmem:[%s713_s1 + $0x30] sm:$0xff]  ;;  %v72_v4 = vld [vmem:[%s713_s1 + $0x28] sm:$0xff] }
   0x3   :  { %23 = vst.msk [vmem:[#allocation2 + $0x20] sm:$0xff] %vm18_vm0, %v484_v2  ;;  %24 = vst.msk [vmem:[#allocation2 + $0x28] sm:$0xff] %vm18_vm0, %v484_v2  ;;  %424 = vmatpush3.msra.mxu0 %v75_v0  ;;  %474 = vmatpush3.msra.mxu1 %v75_v0  ;;  %v71_v5 = vld [vmem:[%s713_s1 + $0x20] sm:$0xff]  ;;  %v70_v6 = vld [vmem:[%s713_s1 + $0x18] sm:$0xff] }
   0x4   :  { %25 = vst.msk [vmem:[#allocation2 + $0x30] sm:$0xff] %vm18_vm0, %v484_v2  ;;  %26 = vst.msk [vmem:[#allocation2 + $0x38] sm:$0xff] %vm18_vm0, %v484_v2  ;;  %425 = vmatprep.subr.mxu0 %v74_v1  ;;  %466 = vmatprep.subr.mxu1 %v74_v1  ;;  %v69_v7 = vld [vmem:[%s713_s1 + $0x10] sm:$0xff]  ;;  %v68_v8 = vld [vmem:[%s713_s1 + $0x8] sm:$0xff] }
   0x5   :  { %27 = vst.msk [vmem:[#allocation2 + $0x40] sm:$0xff] %vm18_vm0, %v484_v2  ;;  %28 = vst.msk [vmem:[#allocation2 + $0x48] sm:$0xff] %vm18_vm0, %v484_v2  ;;  %426 = vmatpush3.msra.mxu0 %v74_v1  ;;  %475 = vmatpush3.msra.mxu1 %v74_v1  ;;  %v67_v9 = vld [vmem:[%s713_s1] sm:$0xff]  ;;  %v52_v12 = vld [vmem:[%s714_s0 + $0x8] sm:$0xff] }
   0x6   :  { %29 = vst.msk [vmem:[#allocation2 + $0x50] sm:$0xff] %vm18_vm0, %v484_v2  ;;  %30 = vst.msk [vmem:[#allocation2 + $0x58] sm:$0xff] %vm18_vm0, %v484_v2  ;;  %427 = vmatprep.subr.mxu0 %v73_v3  ;;  %467 = vmatprep.subr.mxu1 %v73_v3  ;;  %v51_v10 = vld [vmem:[%s714_s0] sm:$0xff]  ;;  %v60_v13 = vld [vmem:[%s714_s0 + $0x48] sm:$0xff] }
   0x7   :  { %31 = vst.msk [vmem:[#allocation2 + $0x60] sm:$0xff] %vm18_vm0, %v484_v2  ;;  %32 = vst.msk [vmem:[#allocation2 + $0x68] sm:$0xff] %vm18_vm0, %v484_v2  ;;  %428 = vmatpush3.msra.mxu0 %v73_v3  ;;  %476 = vmatpush3.msra.mxu1 %v73_v3  ;;  %v59_v11 = vld [vmem:[%s714_s0 + $0x40] sm:$0xff]  ;;  %v53_v14 = vld [vmem:[%s714_s0 + $0x10] sm:$0xff] }
   0x8   :  { %33 = vst.msk [vmem:[#allocation2 + $0x70] sm:$0xff] %vm18_vm0, %v484_v2  ;;  %34 = vst.msk [vmem:[#allocation2 + $0x78] sm:$0xff] %vm18_vm0, %v484_v2  ;;  %429 = vmatprep.subr.mxu0 %v72_v4  ;;  %468 = vmatprep.subr.mxu1 %v72_v4  ;;  %v61_v15 = vld [vmem:[%s714_s0 + $0x50] sm:$0xff]  ;;  %v54_v16 = vld [vmem:[%s714_s0 + $0x18] sm:$0xff] }
   0x9   :  { %430 = vmatpush3.msra.mxu0 %v72_v4  ;;  %477 = vmatpush3.msra.mxu1 %v72_v4  ;;  %v62_v17 = vld [vmem:[%s714_s0 + $0x58] sm:$0xff]  ;;  %v55_v18 = vld [vmem:[%s714_s0 + $0x20] sm:$0xff]  ;;  %v56_v20 = vld [vmem:[%s714_s0 + $0x28] sm:$0xff] }
   0xa   :  { %431 = vmatprep.subr.mxu0 %v71_v5  ;;  %469 = vmatprep.subr.mxu1 %v71_v5  ;;  %v63_v19 = vld [vmem:[%s714_s0 + $0x60] sm:$0xff]  ;;  %v64_v21 = vld [vmem:[%s714_s0 + $0x68] sm:$0xff]  ;;  %v57_v22 = vld [vmem:[%s714_s0 + $0x30] sm:$0xff] }
   0xb   :  { %432 = vmatpush3.msra.mxu0 %v71_v5  ;;  %478 = vmatpush3.msra.mxu1 %v71_v5  ;;  %v65_v23 = vld [vmem:[%s714_s0 + $0x70] sm:$0xff]  ;;  %v58_v24 = vld [vmem:[%s714_s0 + $0x38] sm:$0xff]  ;;  %v36_v26 = vld [vmem:[#allocation2 + $0x8] sm:$0xff] }
   0xc   :  { %433 = vmatprep.subr.mxu0 %v70_v6  ;;  %470 = vmatprep.subr.mxu1 %v70_v6  ;;  %v66_v25 = vld [vmem:[%s714_s0 + $0x78] sm:$0xff]  ;;  %v44_v27 = vld [vmem:[#allocation2 + $0x48] sm:$0xff]  ;;  %v35_v30 = vld [vmem:[#allocation2] sm:$0xff] }
   0xd   :  { %434 = vmatpush3.msra.mxu0 %v70_v6  ;;  %479 = vmatpush3.msra.mxu1 %v70_v6  ;;  %v43_v31 = vld [vmem:[#allocation2 + $0x40] sm:$0xff]  ;;  %v38_v36 = vld [vmem:[#allocation2 + $0x18] sm:$0xff]  ;;  %v37_v42 = vld [vmem:[#allocation2 + $0x10] sm:$0xff] }
   0xe   :  { %435 = vmatprep.subr.mxu0 %v69_v7  ;;  %471 = vmatprep.subr.mxu1 %v69_v7  ;;  %v46_v37 = vld [vmem:[#allocation2 + $0x58] sm:$0xff]  ;;  %v45_v43 = vld [vmem:[#allocation2 + $0x50] sm:$0xff]  ;;  %v40_v48 = vld [vmem:[#allocation2 + $0x28] sm:$0xff] }
   0xf   :  { %436 = vmatpush3.msra.mxu0 %v69_v7  ;;  %480 = vmatpush3.msra.mxu1 %v69_v7  ;;  %v48_v49 = vld [vmem:[#allocation2 + $0x68] sm:$0xff]  ;;  %v621_v52 = vld [vmem:[%s715_s2] ss:$0 sm:$0xff]  ;;  %v42_v3 = vld [vmem:[#allocation2 + $0x38] sm:$0xff] }
  0x10   :  { %437 = vmatprep.subr.mxu0 %v68_v8  ;;  %472 = vmatprep.subr.mxu1 %v68_v8  ;;  %v39_v55 = vld [vmem:[#allocation2 + $0x20] sm:$0xff]  ;;  %v50_v4 = vld [vmem:[#allocation2 + $0x78] sm:$0xff] }
  0x11   :  { %438 = vmatpush3.msra.mxu0 %v68_v8  ;;  %481 = vmatpush3.msra.mxu1 %v68_v8  ;;  %v47_v56 = vld [vmem:[#allocation2 + $0x60] sm:$0xff] }
  0x12   :  { %439 = vmatprep.subr.mxu0 %v67_v9  ;;  %473 = vmatprep.subr.mxu1 %v67_v9 }
  0x13   :  { %440 = vmatpush3.msra.mxu0 %v67_v9  ;;  %482 = vmatpush3.msra.mxu1 %v67_v9 }
  0x14   :  { %441 = vmatprep.mubr.msk.f32.mxu0 %vm76_vm1, %v51_v10  ;;  %453 = vmatprep.mubr.msk.f32.mxu1 %vm76_vm1, %v59_v11 }
  0x15   :  { %442 = vmatmul.mubr.msk.f32.vlgmr.msra.gmra.mxu0 %vm76_vm1, %v52_v12  ;;  %454 = vmatmul.mubr.msk.f32.vlgmr.msra.gmra.mxu1 %vm76_vm1, %v60_v13  ;;  %v41_v13 = vld [vmem:[#allocation2 + $0x30] sm:$0xff] }
  0x16   :  { %444 = vmatprep.mubr.msk.f32.mxu0 %vm76_vm1, %v53_v14  ;;  %456 = vmatprep.mubr.msk.f32.mxu1 %vm76_vm1, %v61_v15  ;;  %v49_v14 = vld [vmem:[#allocation2 + $0x70] sm:$0xff] }
  0x19   :  { %445 = vmatmul.mubr.msk.f32.gmra.mxu0 %vm76_vm1, %v54_v16  ;;  %457 = vmatmul.mubr.msk.f32.gmra.mxu1 %vm76_vm1, %v62_v17 }
  0x1a   :  { %447 = vmatprep.mubr.msk.f32.mxu0 %vm76_vm1, %v55_v18  ;;  %459 = vmatprep.mubr.msk.f32.mxu1 %vm76_vm1, %v63_v19 }
  0x1d   :  { %448 = vmatmul.mubr.msk.f32.gmra.mxu0 %vm76_vm1, %v56_v20  ;;  %460 = vmatmul.mubr.msk.f32.gmra.mxu1 %vm76_vm1, %v64_v21 }
  0x1e   :  { %450 = vmatprep.mubr.msk.f32.mxu0 %vm76_vm1, %v57_v22  ;;  %462 = vmatprep.mubr.msk.f32.mxu1 %vm76_vm1, %v65_v23 }
  0x21   :  { %451 = vmatmul.mubr.msk.f32.gmra.mxu0 %vm76_vm1, %v58_v24  ;;  %463 = vmatmul.mubr.msk.f32.gmra.mxu1 %vm76_vm1, %v66_v25 }
  0xd5   :  { %v443_v28 = vpop.f32.mrf.mxu0  ;;  %v455_v29 = vpop.f32.mrf.mxu1 }
  0xd6   :  { %v271_v32 = vadd.f32 %v443_v28, %v36_v26  ;;  %v279_v33 = vadd.f32 %v455_v29, %v44_v27 }
  0xd7   :  { %v191_v34 = vpop.f32.mrf.mxu0  ;;  %v231_v35 = vpop.f32.mrf.mxu1 }
  0xd8   :  { %288 = vst.msk [vmem:[#allocation2 + $0x8] sm:$0xff] %vm18_vm0, %v271_v32  ;;  %296 = vst.msk [vmem:[#allocation2 + $0x48] sm:$0xff] %vm18_vm0, %v279_v33  ;;  %v270_v38 = vadd.f32 %v191_v34, %v35_v30  ;;  %v278_v39 = vadd.f32 %v231_v35, %v43_v31 }
  0xd9   :  { %v446_v40 = vpop.f32.mrf.mxu0  ;;  %v458_v41 = vpop.f32.mrf.mxu1 }
  0xda   :  { %287 = vst.msk [vmem:[#allocation2] sm:$0xff] %vm18_vm0, %v270_v38  ;;  %295 = vst.msk [vmem:[#allocation2 + $0x40] sm:$0xff] %vm18_vm0, %v278_v39  ;;  %v273_v44 = vadd.f32 %v446_v40, %v38_v36  ;;  %v281_v45 = vadd.f32 %v458_v41, %v46_v37 }
  0xdb   :  { %v201_v46 = vpop.f32.mrf.mxu0  ;;  %v241_v47 = vpop.f32.mrf.mxu1 }
  0xdc   :  { %290 = vst.msk [vmem:[#allocation2 + $0x18] sm:$0xff] %vm18_vm0, %v273_v44  ;;  %298 = vst.msk [vmem:[#allocation2 + $0x58] sm:$0xff] %vm18_vm0, %v281_v45  ;;  %v272_v50 = vadd.f32 %v201_v46, %v37_v42  ;;  %v280_v51 = vadd.f32 %v241_v47, %v45_v43 }
  0xdd   :  { %v449_v53 = vpop.f32.mrf.mxu0  ;;  %v461_v54 = vpop.f32.mrf.mxu1 }
  0xde   :  { %289 = vst.msk [vmem:[#allocation2 + $0x10] sm:$0xff] %vm18_vm0, %v272_v50  ;;  %297 = vst.msk [vmem:[#allocation2 + $0x50] sm:$0xff] %vm18_vm0, %v280_v51  ;;  %v275_v57 = vadd.f32 %v449_v53, %v40_v48  ;;  %v283_v58 = vadd.f32 %v461_v54, %v48_v49 }
  0xdf   :  { %v307_v59 = vld [vmem:[#allocation2 + $0x8] sm:$0xff]  ;;  %v211_v61 = vpop.f32.mrf.mxu0  ;;  %v251_v62 = vpop.f32.mrf.mxu1 }
  0xe0   :  { %v315_v60 = vld [vmem:[#allocation2 + $0x48] sm:$0xff]  ;;  %v330_v63 = vadd.f32 %v621_v52, %v307_v59  ;;  %292 = vst.msk [vmem:[#allocation2 + $0x28] sm:$0xff] %vm18_vm0, %v275_v57  ;;  %300 = vst.msk [vmem:[#allocation2 + $0x68] sm:$0xff] %vm18_vm0, %v283_v58  ;;  %v274_v1 = vadd.f32 %v211_v61, %v39_v55  ;;  %v282_v2 = vadd.f32 %v251_v62, %v47_v56 }
  0xe1   :  { %v338_v0 = vadd.f32 %v621_v52, %v315_v60  ;;  %v306_v5 = vld [vmem:[#allocation2] sm:$0xff]  ;;  %v452_v7 = vpop.f32.mrf.mxu0  ;;  %v464_v8 = vpop.f32.mrf.mxu1 }
  0xe2   :  { %v314_v6 = vld [vmem:[#allocation2 + $0x40] sm:$0xff]  ;;  %v346_v9 = vmax.f32 %v330_v63, 0.0  ;;  %v329_v11 = vadd.f32 %v621_v52, %v306_v5  ;;  %291 = vst.msk [vmem:[#allocation2 + $0x20] sm:$0xff] %vm18_vm0, %v274_v1  ;;  %299 = vst.msk [vmem:[#allocation2 + $0x60] sm:$0xff] %vm18_vm0, %v282_v2  ;;  %v277_v17 = vadd.f32 %v452_v7, %v42_v3  ;;  %v285_v18 = vadd.f32 %v464_v8, %v50_v4 }
  0xe3   :  { %v354_v10 = vmax.f32 %v338_v0, 0.0  ;;  %v337_v12 = vadd.f32 %v621_v52, %v314_v6  ;;  %v309_v15 = vld [vmem:[#allocation2 + $0x18] sm:$0xff]  ;;  %v221_v19 = vpop.f32.mrf.mxu0  ;;  %v261_v20 = vpop.f32.mrf.mxu1 }
  0xe4   :  { %v317_v16 = vld [vmem:[#allocation2 + $0x58] sm:$0xff]  ;;  %362 = vst.msk [vmem:[%s716_s3 + $0x8] sm:$0xff] %vm18_vm0, %v346_v9  ;;  %v345_v21 = vmax.f32 %v329_v11, 0.0  ;;  %v332_v23 = vadd.f32 %v621_v52, %v309_v15  ;;  %294 = vst.msk [vmem:[#allocation2 + $0x38] sm:$0xff] %vm18_vm0, %v277_v17  ;;  %v276_v27 = vadd.f32 %v221_v19, %v41_v13  ;;  %v284_v28 = vadd.f32 %v261_v20, %v49_v14 }
  0xe5   :  { %370 = vst.msk [vmem:[%s716_s3 + $0x48] sm:$0xff] %vm18_vm0, %v354_v10  ;;  %v353_v22 = vmax.f32 %v337_v12, 0.0  ;;  %v340_v24 = vadd.f32 %v621_v52, %v317_v16  ;;  %v308_v25 = vld [vmem:[#allocation2 + $0x10] sm:$0xff]  ;;  %302 = vst.msk [vmem:[#allocation2 + $0x78] sm:$0xff] %vm18_vm0, %v285_v18 }
  0xe6   :  { %v316_v26 = vld [vmem:[#allocation2 + $0x50] sm:$0xff]  ;;  %361 = vst.msk [vmem:[%s716_s3] sm:$0xff] %vm18_vm0, %v345_v21  ;;  %v348_v29 = vmax.f32 %v332_v23, 0.0  ;;  %v331_v31 = vadd.f32 %v621_v52, %v308_v25  ;;  %293 = vst.msk [vmem:[#allocation2 + $0x30] sm:$0xff] %vm18_vm0, %v276_v27 }
  0xe7   :  { %369 = vst.msk [vmem:[%s716_s3 + $0x40] sm:$0xff] %vm18_vm0, %v353_v22  ;;  %v356_v30 = vmax.f32 %v340_v24, 0.0  ;;  %v339_v32 = vadd.f32 %v621_v52, %v316_v26  ;;  %v311_v33 = vld [vmem:[#allocation2 + $0x28] sm:$0xff]  ;;  %301 = vst.msk [vmem:[#allocation2 + $0x70] sm:$0xff] %vm18_vm0, %v284_v28 }
  0xe8   :  { %v319_v34 = vld [vmem:[#allocation2 + $0x68] sm:$0xff]  ;;  %364 = vst.msk [vmem:[%s716_s3 + $0x18] sm:$0xff] %vm18_vm0, %v348_v29  ;;  %v347_v35 = vmax.f32 %v331_v31, 0.0  ;;  %v334_v37 = vadd.f32 %v621_v52, %v311_v33 }
  0xe9   :  { %372 = vst.msk [vmem:[%s716_s3 + $0x58] sm:$0xff] %vm18_vm0, %v356_v30  ;;  %v355_v36 = vmax.f32 %v339_v32, 0.0  ;;  %v342_v38 = vadd.f32 %v621_v52, %v319_v34  ;;  %v310_v39 = vld [vmem:[#allocation2 + $0x20] sm:$0xff] }
  0xea   :  { %v318_v40 = vld [vmem:[#allocation2 + $0x60] sm:$0xff]  ;;  %363 = vst.msk [vmem:[%s716_s3 + $0x10] sm:$0xff] %vm18_vm0, %v347_v35  ;;  %v350_v41 = vmax.f32 %v334_v37, 0.0  ;;  %v333_v43 = vadd.f32 %v621_v52, %v310_v39 }
  0xeb   :  { %371 = vst.msk [vmem:[%s716_s3 + $0x50] sm:$0xff] %vm18_vm0, %v355_v36  ;;  %v358_v42 = vmax.f32 %v342_v38, 0.0  ;;  %v341_v44 = vadd.f32 %v621_v52, %v318_v40  ;;  %v313_v47 = vld [vmem:[#allocation2 + $0x38] sm:$0xff] }
  0xec   :  { %366 = vst.msk [vmem:[%s716_s3 + $0x28] sm:$0xff] %vm18_vm0, %v350_v41  ;;  %v349_v45 = vmax.f32 %v333_v43, 0.0  ;;  %v321_v48 = vld [vmem:[#allocation2 + $0x78] sm:$0xff]  ;;  %v336_v49 = vadd.f32 %v621_v52, %v313_v47 }
  0xed   :  { %374 = vst.msk [vmem:[%s716_s3 + $0x68] sm:$0xff] %vm18_vm0, %v358_v42  ;;  %v357_v46 = vmax.f32 %v341_v44, 0.0  ;;  %v344_v50 = vadd.f32 %v621_v52, %v321_v48  ;;  %v312_v51 = vld [vmem:[#allocation2 + $0x30] sm:$0xff] }
  0xee   :  { %365 = vst.msk [vmem:[%s716_s3 + $0x20] sm:$0xff] %vm18_vm0, %v349_v45  ;;  %v320_v53 = vld [vmem:[#allocation2 + $0x70] sm:$0xff]  ;;  %v352_v54 = vmax.f32 %v336_v49, 0.0  ;;  %v335_v56 = vadd.f32 %v621_v52, %v312_v51 }
  0xef   :  { %373 = vst.msk [vmem:[%s716_s3 + $0x60] sm:$0xff] %vm18_vm0, %v357_v46  ;;  %v360_v55 = vmax.f32 %v344_v50, 0.0  ;;  %v343_v57 = vadd.f32 %v621_v52, %v320_v53 }
  0xf0   :  { %368 = vst.msk [vmem:[%s716_s3 + $0x38] sm:$0xff] %vm18_vm0, %v352_v54  ;;  %v351_v58 = vmax.f32 %v335_v56, 0.0 }
  0xf1   :  { %376 = vst.msk [vmem:[%s716_s3 + $0x78] sm:$0xff] %vm18_vm0, %v360_v55  ;;  %v359_v59 = vmax.f32 %v343_v57, 0.0 }
  0xf2   :  { %367 = vst.msk [vmem:[%s716_s3 + $0x30] sm:$0xff] %vm18_vm0, %v351_v58 }
  0xf3   :  { %375 = vst.msk [vmem:[%s716_s3 + $0x70] sm:$0xff] %vm18_vm0, %v359_v59 }

</bundles_post_ra>
